<compile_context>
chip_gen: v7x
topology: tpu7x:2x2x1
jax: 0.10.0
libtpu: 0.0.40
codegen_flags: <defaults>
</compile_context>

<pallas_src>
import math

import numpy as np
import jax
import jax.numpy as jnp
from jax.experimental import pallas as pl
from jax.experimental.pallas import tpu as pltpu


# ----------------------------------------------------------------------------
# Deterministic re-implementation of FixedRandomResizedCrop.get_params
# (torch RNG replaced by a seeded numpy Generator; init-time host code).
# ----------------------------------------------------------------------------
def get_params(height, width, scale, ratio, seed=0):
    rng = np.random.default_rng(seed)
    area = height * width
    log_ratio = (math.log(ratio[0]), math.log(ratio[1]))
    for _ in range(10):
        target_area = area * rng.uniform(scale[0], scale[1])
        aspect_ratio = math.exp(rng.uniform(log_ratio[0], log_ratio[1]))
        w = int(round(math.sqrt(target_area * aspect_ratio)))
        h = int(round(math.sqrt(target_area / aspect_ratio)))
        if 0 < w <= width and 0 < h <= height:
            i = int(rng.integers(0, height - h + 1))
            j = int(rng.integers(0, width - w + 1))
            return i, j, h, w
    # fallback: center crop
    in_ratio = float(width) / float(height)
    if in_ratio < min(ratio):
        w = width
        h = int(round(w / min(ratio)))
    elif in_ratio > max(ratio):
        h = height
        w = int(round(h * max(ratio)))
    else:
        w = width
        h = height
    i = (height - h) // 2
    j = (width - w) // 2
    return i, j, h, w


# ----------------------------------------------------------------------------
# 1-D bilinear interpolation weight matrix (align_corners=False, no antialias),
# matching torch.nn.functional.interpolate(mode="bilinear").
# ----------------------------------------------------------------------------
def bilinear_weight_matrix(in_size, out_size):
    W = np.zeros((out_size, in_size), dtype=np.float32)
    scale = in_size / out_size
    for o in range(out_size):
        src = (o + 0.5) * scale - 0.5
        if src < 0.0:          # PyTorch clamps negative source indices to 0
            src = 0.0
        i0 = int(math.floor(src))
        frac = src - i0
        i0c = min(max(i0, 0), in_size - 1)
        i1c = min(max(i0 + 1, 0), in_size - 1)
        W[o, i0c] += (1.0 - frac)
        W[o, i1c] += frac
    return W


# ----------------------------------------------------------------------------
# Plane-block (TB) selection: smallest fold whose output lane width is a
# multiple of 128, grown to amortize per-step overhead while the block and the
# TB^2-sized block-diagonal weight stay well inside a conservative VMEM budget
# (sized for v7x's 64 MiB physical VMEM; v5e/v6e have 128 MiB).
# ----------------------------------------------------------------------------
_VMEM_BUDGET = 40 * 1024 * 1024
_VMEM_LIMIT_BYTES = 48 * 1024 * 1024   # scoped VMEM limit with headroom (< 64 MiB)


def _choose_plane_block(n_planes, h, w, out_h, out_w):
    base = 128 // math.gcd(out_w, 128)          # TB*out_w % 128 == 0

    def vmem_bytes(t):
        return (2 * t * h * w * 2               # bf16 input slab, double-buffered
                + 2 * t * out_h * out_w * 4     # f32 output slab, double-buffered
                + out_h * h * 2                 # Wh (resident)
                + (t * w) * (t * out_w) * 2)    # block-diag Ww^T (grows ~ t^2)

    # No point making blocks (much) larger than the workload; cap at 64 planes.
    cap = max(base, min(64, -(-n_planes // base) * base))
    tb = base
    while (tb * 2 <= cap
           and tb * 2 * out_w <= 2048           # bound block-diag MXU inflation
           and vmem_bytes(tb * 2) <= _VMEM_BUDGET):
        tb *= 2
    while tb > 1 and vmem_bytes(tb) > _VMEM_BUDGET:
        tb //= 2
    return max(tb, 1)


# ----------------------------------------------------------------------------
# Pallas kernel: one block of TB planes, folded into lanes.
#   x_ref      : (1, h, TB*w)            bf16   (plane b occupies lanes b*w..)
#   wh_ref     : (out_h, h)              bf16
#   wwt_bd_ref : (TB*w, TB*out_w)        bf16   block_diag(Ww^T, TB)
#   o_ref      : (1, out_h, TB*out_w)    f32
# Two plain 2-D matmuls, f32 accumulation, lane-dense unmasked stores.
# ----------------------------------------------------------------------------
def _resize_block_kernel(wh_ref, wwt_bd_ref, x_ref, o_ref):
    x = x_ref[0]                                               # (h, TB*w) bf16
    # Height pass (exact, big-N): (out_h, h) @ (h, TB*w) -> (out_h, TB*w) f32
    tmp = jnp.dot(wh_ref[...], x, preferred_element_type=jnp.float32)
    # Width pass, fused over TB planes via the block-diagonal weight:
    # (out_h, TB*w) @ (TB*w, TB*out_w) -> (out_h, TB*out_w) f32
    tmp = tmp.astype(jnp.bfloat16)
    out = jnp.dot(tmp, wwt_bd_ref[...], preferred_element_type=jnp.float32)
    o_ref[0] = out.astype(o_ref.dtype)


def fixed_random_resized_crop(img, i, j, h, w, size):
    """img: (B, C, H, W) float; returns (B, C, size[0], size[1]) same dtype."""
    B, C, H, W = img.shape
    out_h, out_w = size
    planes = B * C

    TB = _choose_plane_block(planes, h, w, out_h, out_w)
    G = pl.cdiv(planes, TB)                  # grid length (plane blocks)
    n_pad = G * TB

    # ---- crop + fold planes into lanes (single fused XLA copy on HBM) -------
    crop = img[:, :, i:i + h, j:j + w].reshape(planes, h, w)
    if n_pad != planes:
        crop = jnp.pad(crop, ((0, n_pad - planes), (0, 0), (0, 0)))
    slab = (crop.reshape(G, TB, h, w)
                .transpose(0, 2, 1, 3)                 # (G, h, TB, w)
                .reshape(G, h, TB * w)
                .astype(jnp.bfloat16))

    # ---- interpolation weights (host-side, bf16, resident in VMEM) ----------
    wh_np = bilinear_weight_matrix(h, out_h)                      # (out_h, h)
    ww_np = bilinear_weight_matrix(w, out_w)                      # (out_w, w)
    wwt_bd_np = np.kron(np.eye(TB, dtype=np.float32), ww_np.T)    # (TB*w, TB*out_w)
    wh = jnp.asarray(wh_np, dtype=jnp.bfloat16)
    wwt_bd = jnp.asarray(wwt_bd_np, dtype=jnp.bfloat16)

    out = pl.pallas_call(
        _resize_block_kernel,
        out_shape=jax.ShapeDtypeStruct((G, out_h, TB * out_w), jnp.float32),
        grid_spec=pltpu.PrefetchScalarGridSpec(
            num_scalar_prefetch=0,
            grid=(G,),
            in_specs=[
                pl.BlockSpec((out_h, h), lambda g: (0, 0)),            # resident
                pl.BlockSpec((TB * w, TB * out_w), lambda g: (0, 0)),  # resident
                pl.BlockSpec((1, h, TB * w), lambda g: (g, 0, 0)),
            ],
            out_specs=pl.BlockSpec((1, out_h, TB * out_w), lambda g: (g, 0, 0)),
        ),
        compiler_params=pltpu.CompilerParams(
            dimension_semantics=("parallel",),
            vmem_limit_bytes=_VMEM_LIMIT_BYTES),
    )(wh, wwt_bd, slab)

    # ---- unfold lanes back into planes and restore (B, C, out_h, out_w) -----
    out = (out.reshape(G, out_h, TB, out_w)
              .transpose(0, 2, 1, 3)                   # (G, TB, out_h, out_w)
              .reshape(n_pad, out_h, out_w)[:planes]
              .reshape(B, C, out_h, out_w))
    return out.astype(img.dtype)


if __name__ == "__main__":
    # Module config (small shapes)
    B, C, H, W = 2, 4, 16, 16
    size = (8, 8)
    scale = (0.08, 1.0)
    ratio = (3.0 / 4.0, 4.0 / 3.0)

    # Fixed crop params chosen once at "init" time, deterministically.
    i, j, h, w = get_params(H, W, scale, ratio, seed=0)

    # Deterministic example input.
    key = jax.random.PRNGKey(0)
    img = jax.random.normal(key, (B, C, H, W), dtype=jnp.float32)

    out = fixed_random_resized_crop(img, i, j, h, w, size)
    out = jax.block_until_ready(out)

    # Sanity check against a full-precision f32 reference of the same math.
    # Tolerance is relaxed because the kernel uses bf16 inputs/weights
    # (f32 MXU accumulation), per the performance review.
    wh_ref = jnp.asarray(bilinear_weight_matrix(h, size[0]))
    ww_ref = jnp.asarray(bilinear_weight_matrix(w, size[1]))
    crop_ref = img[:, :, i:i + h, j:j + w]
    ref = jnp.einsum("oh,bchw,pw->bcop", wh_ref, crop_ref, ww_ref)
    assert out.shape == (B, C, size[0], size[1])
    max_err = float(jnp.max(jnp.abs(out - ref)))
    assert max_err < 0.1, f"max abs error {max_err}"

    print("KERNEL_OK")
</pallas_src>

<mosaic_0001>
module attributes {stable_mosaic.version = 11 : i64} {
  func.func @_resize_block_kernel(%arg0: i32, %arg1: memref<8x14xbf16, #tpu.memory_space<vmem>>, %arg2: memref<192x128xbf16, #tpu.memory_space<vmem>>, %arg3: memref<1x14x192xbf16, #tpu.memory_space<vmem>>, %arg4: memref<1x8x128xf32, #tpu.memory_space<vmem>>) attributes {dimension_semantics = [#tpu.dimension_semantics<parallel>], iteration_bounds = array<i64: 1>, scalar_prefetch = 0 : i64, scratch_operands = 0 : i64, tpu.core_type = #tpu.core_type<tc>, window_params = [{pipeline_mode = #tpu.pipeline_mode<synchronous>, transform_indices = @transform_0, window_bounds = array<i64: 8, 14>}, {pipeline_mode = #tpu.pipeline_mode<synchronous>, transform_indices = @transform_1, window_bounds = array<i64: 192, 128>}, {transform_indices = @transform_2, window_bounds = array<i64: 1, 14, 192>}, {transform_indices = @transform_3, window_bounds = array<i64: 1, 8, 128>}]} {
    %c0 = arith.constant 0 : index
    %c0_0 = arith.constant 0 : index
    %c0_1 = arith.constant 0 : index
    %0 = vector.load %arg3[%c0, %c0_0, %c0_1] : memref<1x14x192xbf16, #tpu.memory_space<vmem>>, vector<1x14x192xbf16>
    %1 = vector.shape_cast %0 : vector<1x14x192xbf16> to vector<14x192xbf16>
    %c0_2 = arith.constant 0 : index
    %c0_3 = arith.constant 0 : index
    %2 = vector.load %arg1[%c0_2, %c0_3] : memref<8x14xbf16, #tpu.memory_space<vmem>>, vector<8x14xbf16>
    %cst = arith.constant dense<0.000000e+00> : vector<8x192xf32>
    %3 = tpu.matmul %2, %1, %cst {dimension_numbers = #tpu.dot_dimension_numbers<[1], [0], [0], [1], [0, 0, 1, 1], [], []>} : vector<8x14xbf16>, vector<14x192xbf16>, vector<8x192xf32> -> vector<8x192xf32>
    %4 = arith.truncf %3 : vector<8x192xf32> to vector<8x192xbf16>
    %c0_4 = arith.constant 0 : index
    %c0_5 = arith.constant 0 : index
    %5 = vector.load %arg2[%c0_4, %c0_5] : memref<192x128xbf16, #tpu.memory_space<vmem>>, vector<192x128xbf16>
    %cst_6 = arith.constant dense<0.000000e+00> : vector<8x128xf32>
    %6 = tpu.matmul %4, %5, %cst_6 {dimension_numbers = #tpu.dot_dimension_numbers<[1], [0], [0], [1], [0, 0, 1, 1], [], []>} : vector<8x192xbf16>, vector<192x128xbf16>, vector<8x128xf32> -> vector<8x128xf32>
    %c0_7 = arith.constant 0 : index
    %c0_8 = arith.constant 0 : index
    %c0_9 = arith.constant 0 : index
    %7 = vector.load %arg4[%c0_7, %c0_8, %c0_9] : memref<1x8x128xf32, #tpu.memory_space<vmem>>, vector<1x8x128xf32>
    %8 = vector.shape_cast %7 : vector<1x8x128xf32> to vector<8x128xf32>
    %9 = vector.shape_cast %6 : vector<8x128xf32> to vector<1x8x128xf32>
    tpu.vector_store %arg4[%c0_7, %c0_8, %c0_9], %9 {strides = array<i32>} : memref<1x8x128xf32, #tpu.memory_space<vmem>>, vector<1x8x128xf32>,
    return
  }
  func.func @transform_0(%arg0: i32) -> (i32, i32) {
    %c0_i32 = arith.constant 0 : i32
    %c0_i32_0 = arith.constant 0 : i32
    %c0_i32_1 = arith.constant 0 : i32
    return %c0_i32, %c0_i32_0 : i32, i32
  }
  func.func @transform_1(%arg0: i32) -> (i32, i32) {
    %c0_i32 = arith.constant 0 : i32
    %c0_i32_0 = arith.constant 0 : i32
    %c0_i32_1 = arith.constant 0 : i32
    return %c0_i32, %c0_i32_0 : i32, i32
  }
  func.func @transform_2(%arg0: i32) -> (i32, i32, i32) {
    %c0_i32 = arith.constant 0 : i32
    %c0_i32_0 = arith.constant 0 : i32
    %c0_i32_1 = arith.constant 0 : i32
    return %arg0, %c0_i32, %c0_i32_0 : i32, i32, i32
  }
  func.func @transform_3(%arg0: i32) -> (i32, i32, i32) {
    %c0_i32 = arith.constant 0 : i32
    %c0_i32_0 = arith.constant 0 : i32
    %c0_i32_1 = arith.constant 0 : i32
    return %arg0, %c0_i32, %c0_i32_0 : i32, i32, i32
  }
}

</mosaic_0001>

<bundles_post_ra>
// kernel: tpu_custom_call.1
= control target key start
LH: loop header
LB: loop body
LE: loop exit
PB: predicated region body
PF: predicated region fallthrough
CT: control target
= control target key end

     0   :  { %8 = vsyncpa [#allocation3], 0  ;;  %s489_s0 = inlined_call_operand.hbm [shape: bf16[8,14], index: 0, kind: input, shape index: {}]   ;;  %s490_s1 = inlined_call_operand.hbm [shape: bf16[192,128], index: 1, kind: input, shape index: {}]   ;;  %s491_s2 = inlined_call_operand.hbm [shape: bf16[1,14,192], index: 2, kind: input, shape index: {}]   ;;  %s492_s3 = inlined_call_operand.hbm [shape: f32[1,8,128], index: 3, kind: output, shape index: {}]  }
   0x1   :  { %9 = vsyncpa [#allocation6], 0 }
   0x2   :  { %10 = vsyncpa [#allocation4], 0  ;;  %s412_s12 = smov [#allocation5]   ;;  %s318_s16 = scalar_lea.hbm %s490_s1, 1536 }
   0x3   :  { %s26_s13 = sshll.u32 %s412_s12, 4  ;;  %p319_p0 = scmp.ne.s32.totalorder %s490_s1, %s318_s16  ;;  %s27_s13 = int_to_ptr.vmem [resolvable:$true] %s26_s13 }
   0x4   :  { %p322_p1 = scmp.lt.u32.totalorder %s318_s16, %s490_s1 }
   0x6   :  { %p324_p2 = pnand %p322_p1, %p319_p0 }
   0x8   :  { %327 = shalt.err (!%p324_p2)
}
   0x9   :  { %s328_s21 = scalar_lea.vmem %s27_s13, 1536  ;;  %p333_p4 = scmp.lt.s32.totalorder %s27_s13, %s27_s13 }
   0xa   :  { %p329_p3 = scmp.ne.s32.totalorder %s27_s13, %s328_s21  ;;  %p334_p5 = scmp.lt.s32.totalorder %s328_s21, %s328_s21 }
   0xc   :  { %p335_p6 = por %p334_p5, %p333_p4 }
   0xe   :  { %p336_p7 = pnand %p335_p6, %p329_p3 }
  0x10   :  { %339 = shalt.err (!%p336_p7)
}
  0x11   :  { %s413_s22 = smov 64   ;;  %s414_s23 = smov 4  }
  0x12   :  { %32 = dma.hbm_to_vmem [thread:$0]  %s490_s1, 1536, %s27_s13, [#allocation6], %s413_s22, %s413_s22, %s414_s23  }
  0x13   :  { %s415_s26 = smov [#allocation2]   ;;  %s416_s28 = smov [#allocation7]  }
  0x14   :  { %s17_s27 = sshll.u32 %s415_s26, 4  ;;  %s38_s29 = sshll.u32 %s416_s28, 4  ;;  %s18_s27 = int_to_ptr.vmem [resolvable:$true] %s17_s27  ;;  %s39_s29 = int_to_ptr.vmem [resolvable:$true] %s38_s29 }
  0x15   :  { %s340_s5 = scalar_lea.hbm %s489_s0, 64 }
  0x16   :  { %p341_p8 = scmp.ne.s32.totalorder %s489_s0, %s340_s5  ;;  %p344_p9 = scmp.lt.u32.totalorder %s340_s5, %s489_s0 }
  0x18   :  { %p346_p10 = pnand %p344_p9, %p341_p8 }
  0x1a   :  { %349 = shalt.err (!%p346_p10)
}
  0x1b   :  { %s350_s1 = scalar_lea.vmem %s18_s27, 64  ;;  %p355_p12 = scmp.lt.s32.totalorder %s18_s27, %s18_s27 }
  0x1c   :  { %p351_p11 = scmp.ne.s32.totalorder %s18_s27, %s350_s1  ;;  %p356_p13 = scmp.lt.s32.totalorder %s350_s1, %s350_s1 }
  0x1e   :  { %p357_p0 = por %p356_p13, %p355_p12 }
  0x20   :  { %p358_p1 = pnand %p357_p0, %p351_p11 }
  0x22   :  { %361 = shalt.err (!%p358_p1)
}
  0x23   :  { %20 = dma.hbm_to_vmem [thread:$0]  %s489_s0, 64, %s18_s27, [#allocation3]  }
  0x24   :  { %s362_s14 = scalar_lea.hbm %s491_s2, 256 }
  0x25   :  { %p363_p2 = scmp.ne.s32.totalorder %s491_s2, %s362_s14  ;;  %p366_p3 = scmp.lt.u32.totalorder %s362_s14, %s491_s2 }
  0x27   :  { %p368_p4 = pnand %p366_p3, %p363_p2 }
  0x29   :  { %371 = shalt.err (!%p368_p4)
}
  0x2a   :  { %s372_s19 = scalar_lea.vmem %s39_s29, 256  ;;  %p377_p6 = scmp.lt.s32.totalorder %s39_s29, %s39_s29 }
  0x2b   :  { %p373_p5 = scmp.ne.s32.totalorder %s39_s29, %s372_s19  ;;  %p378_p7 = scmp.lt.s32.totalorder %s372_s19, %s372_s19 }
  0x2d   :  { %p379_p8 = por %p378_p7, %p377_p6 }
  0x2f   :  { %p380_p9 = pnand %p379_p8, %p373_p5 }
  0x31   :  { %383 = shalt.err (!%p380_p9)
}
  0x32   :  { %s417_s0 = smov 128   ;;  %s418_s20 = smov 8  }
  0x33   :  { %44 = dma.hbm_to_vmem [thread:$0]  %s491_s2, 256, %s39_s29, [#allocation6], %s417_s0, %s417_s0, %s418_s20  }
  0x34   :  { %406 = dma.done.wait [#allocation3], 64  }
  0x35   :  { %407 = vsyncadd [#allocation3], 4294967232 }
  0x36   :  { %408 = dma.done.wait [#allocation6], 1792  }
  0x37   :  { %409 = vsyncadd [#allocation6], 4294965504  ;;  %v419_v0 = vmov 0   ;;  %vm70_vm0 = vcmask 1046528   ;;  %vm66_vm1 = vcmask 113664   ;;  %v306_v3 = vld [vmem:[#allocation5] sm:$0xff]  }
  0x38   :  { %109 = vmatprep.mubr.bf16.mxu0 %v419_v0  ;;  %220 = vmatprep.subr.bf16.mxu1 %v419_v0  ;;  %v303_v1 = vld [vmem:[#allocation7 + $0x4] ss:$8 sps:$4 sm:$0x7f]   ;;  %v305_v2 = vld [vmem:[#allocation7] ss:$8 sps:$4 sm:$0x7f]  }
  0x39   :  { %279 = vmatprep.subr.msk.bf16.mxu0 %vm70_vm0, %v303_v1  ;;  %v72_v4 = vsel %vm70_vm0, %v305_v2, 0  ;;  %221 = vmatpush1.bf16.msra.mxu1 %v306_v3  ;;  %v307_v5 = vld [vmem:[#allocation5 + $0x8] sm:$0xff]   ;;  %v57_v6 = vld [vmem:[#allocation2] sm:$0xf]  ;;  %v308_v7 = vld [vmem:[#allocation5 + $0x10] sm:$0xff]   ;;  %vm216_vm2 = vcmask 523264  }
  0x3a   :  { %78 = vmatpush1.bf16.msra.mxu0 %v72_v4  ;;  %222 = vmatprep.subr.bf16.mxu1 %v419_v0  ;;  %v309_v8 = vld [vmem:[#allocation5 + $0x18] sm:$0xff]   ;;  %v310_v9 = vld [vmem:[#allocation5 + $0x20] sm:$0xff]   ;;  %v311_v10 = vld [vmem:[#allocation5 + $0x28] sm:$0xff]   ;;  %s420_s2 = smov [#allocation8]  }
  0x3b   :  { %v312_v11 = vld [vmem:[#allocation5 + $0x30] sm:$0xff]   ;;  %v313_v12 = vld [vmem:[#allocation5 + $0x38] sm:$0xff]   ;;  %v314_v13 = vld [vmem:[#allocation5 + $0x40] sm:$0xff]   ;;  %s267_s23 = sshll.u32 %s420_s2, 4  ;;  %s268_s23 = int_to_ptr.vmem [resolvable:$true] %s267_s23 }
  0x3c   :  { %v315_v14 = vld [vmem:[#allocation5 + $0x48] sm:$0xff]   ;;  %v316_v15 = vld [vmem:[#allocation5 + $0x50] sm:$0xff]   ;;  %v317_v16 = vld [vmem:[#allocation5 + $0x58] sm:$0xff]   ;;  %s384_s24 = scalar_lea.vmem %s268_s23, 128  ;;  %p389_p11 = scmp.lt.s32.totalorder %s268_s23, %s268_s23 }
  0x3d   :  { %280 = vmatmul.mubr.msk.bf16.vlgmr.msra.gmra.mrb[0].mxu0 %vm66_vm1, %v57_v6  ;;  %223 = vmatpush1.bf16.msra.mxu1 %v307_v5  ;;  %p385_p10 = scmp.ne.s32.totalorder %s268_s23, %s384_s24  ;;  %p390_p12 = scmp.lt.s32.totalorder %s384_s24, %s384_s24 }
  0x3e   :  { %224 = vmatprep.subr.bf16.mxu1 %v419_v0 }
  0x3f   :  { %p391_p13 = por %p390_p12, %p389_p11 }
  0x41   :  { %225 = vmatpush1.bf16.msra.mxu1 %v308_v7  ;;  %p392_p0 = pnand %p391_p13, %p385_p10 }
  0x42   :  { %226 = vmatprep.subr.bf16.mxu1 %v419_v0 }
  0x45   :  { %227 = vmatpush1.bf16.msra.mxu1 %v309_v8 }
  0x46   :  { %228 = vmatprep.subr.bf16.mxu1 %v419_v0 }
  0x49   :  { %229 = vmatpush1.bf16.msra.mxu1 %v310_v9 }
  0x4a   :  { %230 = vmatprep.subr.bf16.mxu1 %v419_v0 }
  0x4d   :  { %231 = vmatpush1.bf16.msra.mxu1 %v311_v10 }
  0x4e   :  { %232 = vmatprep.subr.bf16.mxu1 %v419_v0 }
  0x51   :  { %233 = vmatpush1.bf16.msra.mxu1 %v312_v11 }
  0x52   :  { %234 = vmatprep.subr.bf16.mxu1 %v419_v0 }
  0x55   :  { %235 = vmatpush1.bf16.msra.mxu1 %v313_v12 }
  0x56   :  { %236 = vmatprep.subr.bf16.mxu1 %v419_v0 }
  0x59   :  { %237 = vmatpush1.bf16.msra.mxu1 %v314_v13 }
  0x5a   :  { %238 = vmatprep.subr.bf16.mxu1 %v419_v0 }
  0x5d   :  { %239 = vmatpush1.bf16.msra.mxu1 %v315_v14 }
  0x5e   :  { %240 = vmatprep.subr.bf16.mxu1 %v419_v0 }
  0x61   :  { %241 = vmatpush1.bf16.msra.mxu1 %v316_v15 }
  0x62   :  { %242 = vmatprep.subr.bf16.mxu1 %v419_v0 }
  0x65   :  { %243 = vmatpush1.bf16.msra.mxu1 %v317_v16 }
 0x110   :  { %v111_v17 = vpop.f32.mrb[0].mxu0 }
 0x111   :  { %v113_v18 = vpop.f32.mrb[1].mxu0  ;;  %v118_v21 = vpack.c.bf16 %v111_v17, %v111_v17 }
 0x112   :  { %v119_v19 = vpack.c.bf16 %v113_v18, %v113_v18  ;;  %v115_v20 = vpop.f32.mrb[2].mxu0 }
 0x113   :  { %v116_v22 = vpop.f32.mrb[3].mxu0 }
 0x114   :  { %293 = vmatprep.mubr.msk.bf16.mxu1 %vm216_vm2, %v119_v19 }
 0x115   :  { %253 = vmatmul.mubr.bf16.vlgmr.msra.gmra.mrb[0].mxu1 %v118_v21 }
 0x1e8   :  { %v254_v23 = vpop.f32.mrb[0].mxu1 }
 0x1e9   :  { %260 = vst [vmem:[#allocation8] sm:$0xff] %v254_v23  ;;  %v256_v24 = vpop.f32.mrb[1].mxu1 }
 0x1ea   :  { %v257_v25 = vpop.f32.mrb[2].mxu1 }
 0x1eb   :  { %395 = shalt.err (!%p392_p0)
}
 0x1ec   :  { %s396_s27 = scalar_lea.hbm %s492_s3, 128 }
 0x1ed   :  { %p397_p1 = scmp.ne.s32.totalorder %s492_s3, %s396_s27  ;;  %p400_p2 = scmp.lt.u32.totalorder %s396_s27, %s492_s3 }
 0x1ef   :  { %p402_p3 = pnand %p400_p2, %p397_p1 }
 0x1f1   :  { %405 = shalt.err (!%p402_p3)
}
 0x1f2   :  { %270 = dma.vmem_to_hbm [thread:$0]  %s268_s23, 128, %s492_s3, [#allocation4]   ;;  %v258_v26 = vpop.f32.mrb[3].mxu1 }
 0x1f3   :  { %410 = dma.done.wait [#allocation4], 128  }
 0x1f4   :  { %411 = vsyncadd [#allocation4], 4294967168 }
 0x1f5   :  { %274 = vsyncpa [#allocation3], 1 }
 0x1f6   :  { %275 = vsyncpa [#allocation6], 1 }
 0x1f7   :  { %276 = vsyncpa [#allocation4], 1 }

</bundles_post_ra>
